<compile_context>
chip_gen: v7x
topology: tpu7x:2x2x1
jax: 0.10.0
libtpu: 0.0.40
codegen_flags: <defaults>
</compile_context>

<pallas_src>
import jax
import jax.numpy as jnp
import numpy as np
from jax import lax
from jax.experimental import pallas as pl
from jax.experimental.pallas import tpu as pltpu


# -----------------------------------------------------------------------------
# Pallas kernels
# -----------------------------------------------------------------------------
def conv_gemm_stats_kernel(a_ref, w_ref, o_ref, sum_ref, sq_ref):
    """Fused: conv-as-GEMM tile + per-channel sum / sum-of-squares accumulation.

    a_ref:   (TM, Kp)   im2col patch rows (zero-padded K / M)
    w_ref:   (Kp, OCp)  flattened, zero-padded conv weights
    o_ref:   (TM, OCp)  conv output tile (f32)
    sum_ref: (1, OCp)   running per-channel sum      (resident across grid)
    sq_ref:  (1, OCp)   running per-channel sum(x^2) (resident across grid)
    """
    @pl.when(pl.program_id(0) == 0)
    def _init():
        sum_ref[...] = jnp.zeros_like(sum_ref)
        sq_ref[...] = jnp.zeros_like(sq_ref)

    acc = jnp.dot(a_ref[...], w_ref[...], preferred_element_type=jnp.float32)
    o_ref[...] = acc
    sum_ref[...] += jnp.sum(acc, axis=0, keepdims=True)
    sq_ref[...] += jnp.sum(acc * acc, axis=0, keepdims=True)


def bn_relu_kernel(y_ref, scale_ref, shift_ref, o_ref):
    """Fused affine-normalize + ReLU:  relu(y * scale + shift)."""
    o_ref[...] = jnp.maximum(y_ref[...] * scale_ref[...] + shift_ref[...], 0.0)


# -----------------------------------------------------------------------------
# Glue (im2col, padding, BN scalar math) in plain JAX
# -----------------------------------------------------------------------------
def _round_up(x, m):
    return (x + m - 1) // m * m


def im2col_nchw(x, kh, kw, stride, pad):
    N, C, H, W = x.shape
    xp = jnp.pad(x, ((0, 0), (0, 0), (pad, pad), (pad, pad)))
    OH = (H + 2 * pad - kh) // stride + 1
    OW = (W + 2 * pad - kw) // stride + 1
    patches = []
    for i in range(kh):
        for j in range(kw):
            patches.append(xp[:, :, i:i + stride * OH:stride, j:j + stride * OW:stride])
    # (N, C, KH*KW, OH, OW) with channel-major then kernel-position ordering
    p = jnp.stack(patches, axis=2).reshape(N, C * kh * kw, OH, OW)
    # -> (N*OH*OW, C*KH*KW)   (K contiguous on the fast axis)
    p = p.transpose(0, 2, 3, 1).reshape(N * OH * OW, C * kh * kw)
    return p, OH, OW


def conv_bn_relu(x, weight, bias, gamma, beta, *, stride, pad, eps=1e-5,
                 tm=256, compute_dtype=jnp.float32, channels_last=False):
    """ConvModule forward (BatchNorm in training mode -> batch statistics)."""
    # A per-channel bias added before training-mode BN is exactly cancelled by
    # the mean subtraction -> skip it (output identical, less work).
    del bias

    N, C, H, W = x.shape
    OC, _, KH, KW = weight.shape

    patches, OH, OW = im2col_nchw(x, KH, KW, stride, pad)          # (M, K)
    M, K = patches.shape

    LANE = 128
    Kp = _round_up(K, LANE)
    OCp = _round_up(OC, LANE)
    Mp = _round_up(M, tm)
    VMEM_LIMIT = 32 * 1024 * 1024   # budget against v7x's 64 MiB physical VMEM

    # Zero-pad to lane-dense shapes (zeros are exact for GEMM and BN sums).
    patches_p = jnp.pad(patches.astype(compute_dtype), ((0, Mp - M), (0, Kp - K)))
    w_mat = weight.reshape(OC, K).T                                 # (K, OC)
    w_p = jnp.pad(w_mat.astype(compute_dtype), ((0, Kp - K), (0, OCp - OC)))

    # --- Pass 1: conv GEMM + fused BN statistics -----------------------------
    conv_out, sum_c, sq_c = pl.pallas_call(
        conv_gemm_stats_kernel,
        out_shape=(jax.ShapeDtypeStruct((Mp, OCp), jnp.float32),
                   jax.ShapeDtypeStruct((1, OCp), jnp.float32),
                   jax.ShapeDtypeStruct((1, OCp), jnp.float32)),
        grid_spec=pltpu.PrefetchScalarGridSpec(
            num_scalar_prefetch=0,
            grid=(Mp // tm,),
            in_specs=[
                pl.BlockSpec((tm, Kp), lambda i: (i, 0)),
                pl.BlockSpec((Kp, OCp), lambda i: (0, 0)),
            ],
            out_specs=[
                pl.BlockSpec((tm, OCp), lambda i: (i, 0)),
                pl.BlockSpec((1, OCp), lambda i: (0, 0)),   # accumulator
                pl.BlockSpec((1, OCp), lambda i: (0, 0)),   # accumulator
            ],
        ),
        compiler_params=pltpu.CompilerParams(
            dimension_semantics=("arbitrary",),             # reduction over M tiles
            vmem_limit_bytes=VMEM_LIMIT),
    )(patches_p, w_p)

    # --- BN scalar math (tiny, f32) ------------------------------------------
    inv_m = jnp.float32(1.0 / M)                  # divide by the TRUE row count
    mean = sum_c * inv_m                                         # (1, OCp)
    var = jnp.maximum(sq_c * inv_m - mean * mean, 0.0)           # biased var, clamped
    inv_std = lax.rsqrt(var + eps)
    gamma_p = jnp.pad(gamma.astype(jnp.float32), (0, OCp - OC)).reshape(1, OCp)
    beta_p = jnp.pad(beta.astype(jnp.float32), (0, OCp - OC)).reshape(1, OCp)
    scale = gamma_p * inv_std
    shift = beta_p - mean * scale

    # --- Pass 2: fused normalize + ReLU (streaming, parallel over M tiles) ---
    out_flat = pl.pallas_call(
        bn_relu_kernel,
        out_shape=jax.ShapeDtypeStruct((Mp, OCp), jnp.float32),
        grid_spec=pltpu.PrefetchScalarGridSpec(
            num_scalar_prefetch=0,
            grid=(Mp // tm,),
            in_specs=[
                pl.BlockSpec((tm, OCp), lambda i: (i, 0)),
                pl.BlockSpec((1, OCp), lambda i: (0, 0)),
                pl.BlockSpec((1, OCp), lambda i: (0, 0)),
            ],
            out_specs=pl.BlockSpec((tm, OCp), lambda i: (i, 0)),
        ),
        compiler_params=pltpu.CompilerParams(
            dimension_semantics=("parallel",),               # megacore-shardable
            vmem_limit_bytes=VMEM_LIMIT),
    )(conv_out, scale, shift)

    # Slice off M/OC padding; reshape to NHWC (free), optionally to NCHW.
    y = out_flat[:M, :OC].reshape(N, OH, OW, OC)
    if channels_last:
        return y                                             # cheaper: no transpose
    return y.transpose(0, 3, 1, 2)                           # PyTorch NCHW parity


# -----------------------------------------------------------------------------
# Pure-JAX reference (PyTorch semantics, incl. conv bias) for correctness check
# -----------------------------------------------------------------------------
def ref_forward(x, weight, bias, gamma, beta, *, stride, pad, eps=1e-5):
    y = lax.conv_general_dilated(
        x, weight, window_strides=(stride, stride),
        padding=[(pad, pad), (pad, pad)],
        dimension_numbers=("NCHW", "OIHW", "NCHW"),
    ) + bias[None, :, None, None]
    mean = y.mean(axis=(0, 2, 3), keepdims=True)
    var = ((y - mean) ** 2).mean(axis=(0, 2, 3), keepdims=True)
    y_hat = (y - mean) / jnp.sqrt(var + eps)
    return jnp.maximum(y_hat * gamma[None, :, None, None] + beta[None, :, None, None], 0.0)


# -----------------------------------------------------------------------------
if __name__ == "__main__":
    # Shapes consistent with ConvModule(input_channels=4, output_channels=8,
    # kernel=3, stride=1, pad=1) on a (2, 4, 16, 16) input.
    N, C, H, W = 2, 4, 16, 16
    OC, KH, KW = 8, 3, 3
    stride, pad = 1, 1

    key = jax.random.PRNGKey(0)
    kx, kwt, kb, kg, kbeta = jax.random.split(key, 5)

    x = jax.random.normal(kx, (N, C, H, W), dtype=jnp.float32)
    fan_in = C * KH * KW
    weight = jax.random.uniform(kwt, (OC, C, KH, KW), jnp.float32,
                                minval=-1.0, maxval=1.0) / jnp.sqrt(fan_in)
    bias = jax.random.uniform(kb, (OC,), jnp.float32, minval=-0.1, maxval=0.1)
    gamma = 1.0 + 0.1 * jax.random.normal(kg, (OC,), jnp.float32)
    beta = 0.1 * jax.random.normal(kbeta, (OC,), jnp.float32)

    ref = ref_forward(x, weight, bias, gamma, beta, stride=stride, pad=pad)

    # f32 MXU path (exact check; also the recommended path on v5e).
    out_f32 = jax.block_until_ready(
        conv_bn_relu(x, weight, bias, gamma, beta, stride=stride, pad=pad,
                     compute_dtype=jnp.float32))
    np.testing.assert_allclose(np.asarray(out_f32), np.asarray(ref),
                               rtol=1e-4, atol=1e-4)

    # bf16 MXU-input path (recommended on v6e/v7x; f32 accumulation + f32 BN math).
    out_bf16 = jax.block_until_ready(
        conv_bn_relu(x, weight, bias, gamma, beta, stride=stride, pad=pad,
                     compute_dtype=jnp.bfloat16))
    np.testing.assert_allclose(np.asarray(out_bf16), np.asarray(ref),
                               rtol=5e-2, atol=5e-2)

    print("KERNEL_OK")
</pallas_src>

<mosaic_0001>
module attributes {stable_mosaic.version = 11 : i64} {
  func.func @conv_gemm_stats_kernel(%arg0: i32, %arg1: memref<256x128xf32, #tpu.memory_space<vmem>>, %arg2: memref<128x128xf32, #tpu.memory_space<vmem>>, %arg3: memref<256x128xf32, #tpu.memory_space<vmem>>, %arg4: memref<1x128xf32, #tpu.memory_space<vmem>>, %arg5: memref<1x128xf32, #tpu.memory_space<vmem>>) attributes {dimension_semantics = [#tpu.dimension_semantics<arbitrary>], iteration_bounds = array<i64: 2>, scalar_prefetch = 0 : i64, scratch_operands = 0 : i64, tpu.core_type = #tpu.core_type<tc>, window_params = [{transform_indices = @transform_0, window_bounds = array<i64: 256, 128>}, {pipeline_mode = #tpu.pipeline_mode<synchronous>, transform_indices = @transform_1, window_bounds = array<i64: 128, 128>}, {transform_indices = @transform_2, window_bounds = array<i64: 256, 128>}, {pipeline_mode = #tpu.pipeline_mode<synchronous>, transform_indices = @transform_3, window_bounds = array<i64: 1, 128>}, {pipeline_mode = #tpu.pipeline_mode<synchronous>, transform_indices = @transform_4, window_bounds = array<i64: 1, 128>}]} {
    %c0_i32 = arith.constant 0 : i32
    %0 = arith.cmpi eq, %arg0, %c0_i32 : i32
    %1 = arith.extui %0 : i1 to i32
    %c0_i32_0 = arith.constant 0 : i32
    %2 = arith.cmpi ne, %1, %c0_i32_0 : i32
    scf.if %2 {
      %cst_16 = arith.constant 0.000000e+00 : f32
      %18 = vector.broadcast %cst_16 : f32 to vector<1x128xf32>
      %c0_17 = arith.constant 0 : index
      %c0_18 = arith.constant 0 : index
      %19 = vector.load %arg4[%c0_17, %c0_18] : memref<1x128xf32, #tpu.memory_space<vmem>>, vector<1x128xf32>
      tpu.vector_store %arg4[%c0_17, %c0_18], %18 {strides = array<i32>} : memref<1x128xf32, #tpu.memory_space<vmem>>, vector<1x128xf32>,
      %cst_19 = arith.constant 0.000000e+00 : f32
      %20 = vector.broadcast %cst_19 : f32 to vector<1x128xf32>
      %c0_20 = arith.constant 0 : index
      %c0_21 = arith.constant 0 : index
      %21 = vector.load %arg5[%c0_20, %c0_21] : memref<1x128xf32, #tpu.memory_space<vmem>>, vector<1x128xf32>
      tpu.vector_store %arg5[%c0_20, %c0_21], %20 {strides = array<i32>} : memref<1x128xf32, #tpu.memory_space<vmem>>, vector<1x128xf32>,
    } else {
    }
    %c0 = arith.constant 0 : index
    %c0_1 = arith.constant 0 : index
    %3 = vector.load %arg1[%c0, %c0_1] : memref<256x128xf32, #tpu.memory_space<vmem>>, vector<256x128xf32>
    %c0_2 = arith.constant 0 : index
    %c0_3 = arith.constant 0 : index
    %4 = vector.load %arg2[%c0_2, %c0_3] : memref<128x128xf32, #tpu.memory_space<vmem>>, vector<128x128xf32>
    %cst = arith.constant dense<0.000000e+00> : vector<256x128xf32>
    %5 = tpu.matmul %3, %4, %cst {dimension_numbers = #tpu.dot_dimension_numbers<[1], [0], [0], [1], [0, 0, 1, 1], [], []>} : vector<256x128xf32>, vector<128x128xf32>, vector<256x128xf32> -> vector<256x128xf32>
    %c0_4 = arith.constant 0 : index
    %c0_5 = arith.constant 0 : index
    %6 = vector.load %arg3[%c0_4, %c0_5] : memref<256x128xf32, #tpu.memory_space<vmem>>, vector<256x128xf32>
    tpu.vector_store %arg3[%c0_4, %c0_5], %5 {strides = array<i32>} : memref<256x128xf32, #tpu.memory_space<vmem>>, vector<256x128xf32>,
    %c0_6 = arith.constant 0 : index
    %c0_7 = arith.constant 0 : index
    %7 = vector.load %arg4[%c0_6, %c0_7] : memref<1x128xf32, #tpu.memory_space<vmem>>, vector<1x128xf32>
    %cst_8 = arith.constant dense<0.000000e+00> : vector<128xf32>
    %8 = vector.multi_reduction <add>, %5, %cst_8 [0] : vector<256x128xf32> to vector<128xf32>
    %9 = vector.shape_cast %8 : vector<128xf32> to vector<1x128xf32>
    %10 = arith.addf %7, %9 : vector<1x128xf32>
    %c0_9 = arith.constant 0 : index
    %c0_10 = arith.constant 0 : index
    %11 = vector.load %arg4[%c0_9, %c0_10] : memref<1x128xf32, #tpu.memory_space<vmem>>, vector<1x128xf32>
    tpu.vector_store %arg4[%c0_9, %c0_10], %10 {strides = array<i32>} : memref<1x128xf32, #tpu.memory_space<vmem>>, vector<1x128xf32>,
    %c0_11 = arith.constant 0 : index
    %c0_12 = arith.constant 0 : index
    %12 = vector.load %arg5[%c0_11, %c0_12] : memref<1x128xf32, #tpu.memory_space<vmem>>, vector<1x128xf32>
    %13 = arith.mulf %5, %5 : vector<256x128xf32>
    %cst_13 = arith.constant dense<0.000000e+00> : vector<128xf32>
    %14 = vector.multi_reduction <add>, %13, %cst_13 [0] : vector<256x128xf32> to vector<128xf32>
    %15 = vector.shape_cast %14 : vector<128xf32> to vector<1x128xf32>
    %16 = arith.addf %12, %15 : vector<1x128xf32>
    %c0_14 = arith.constant 0 : index
    %c0_15 = arith.constant 0 : index
    %17 = vector.load %arg5[%c0_14, %c0_15] : memref<1x128xf32, #tpu.memory_space<vmem>>, vector<1x128xf32>
    tpu.vector_store %arg5[%c0_14, %c0_15], %16 {strides = array<i32>} : memref<1x128xf32, #tpu.memory_space<vmem>>, vector<1x128xf32>,
    return
  }
  func.func @transform_0(%arg0: i32) -> (i32, i32) {
    %c0_i32 = arith.constant 0 : i32
    %c0_i32_0 = arith.constant 0 : i32
    return %arg0, %c0_i32 : i32, i32
  }
  func.func @transform_1(%arg0: i32) -> (i32, i32) {
    %c0_i32 = arith.constant 0 : i32
    %c0_i32_0 = arith.constant 0 : i32
    %c0_i32_1 = arith.constant 0 : i32
    return %c0_i32, %c0_i32_0 : i32, i32
  }
  func.func @transform_2(%arg0: i32) -> (i32, i32) {
    %c0_i32 = arith.constant 0 : i32
    %c0_i32_0 = arith.constant 0 : i32
    return %arg0, %c0_i32 : i32, i32
  }
  func.func @transform_3(%arg0: i32) -> (i32, i32) {
    %c0_i32 = arith.constant 0 : i32
    %c0_i32_0 = arith.constant 0 : i32
    %c0_i32_1 = arith.constant 0 : i32
    return %c0_i32, %c0_i32_0 : i32, i32
  }
  func.func @transform_4(%arg0: i32) -> (i32, i32) {
    %c0_i32 = arith.constant 0 : i32
    %c0_i32_0 = arith.constant 0 : i32
    %c0_i32_1 = arith.constant 0 : i32
    return %c0_i32, %c0_i32_0 : i32, i32
  }
}

</mosaic_0001>

<bundles_post_ra>
// kernel: tpu_custom_call.1
= control target key start
LH: loop header
LB: loop body
LE: loop exit
PB: predicated region body
PF: predicated region fallthrough
CT: control target
= control target key end

     0   :  { %10 = vsyncpa [#allocation3], 0  ;;  %s1711_s0 = inlined_call_operand.hbm [shape: f32[512,128], index: 0, kind: input, shape index: {}]   ;;  %s1712_s1 = inlined_call_operand.hbm [shape: f32[128,128], index: 1, kind: input, shape index: {}]   ;;  %s1713_s2 = inlined_call_operand.hbm [shape: f32[512,128], index: 2, kind: output, shape index: {0}]   ;;  %s1714_s3 = inlined_call_operand.hbm [shape: f32[1,128], index: 3, kind: output, shape index: {1}]   ;;  %s1715_s4 = inlined_call_operand.hbm [shape: f32[1,128], index: 4, kind: output, shape index: {2}]  }
   0x1   :  { %12 = vsyncpa [#allocation3 + $0x1], 0 }
   0x2   :  { %13 = vsyncpa [#allocation6], 0 }
   0x3   :  { %14 = vsyncpa [#allocation4], 0 }
   0x4   :  { %16 = vsyncpa [#allocation4 + $0x1], 0 }
   0x5   :  { %17 = vsyncpa [#allocation9], 0  ;;  %s1288_s15 = smov 0   ;;  %s1290_s16 = smov 0  }
   0x6   :  { %s1292_s17 = smov 0   ;;  %s1294_s18 = smov 0  }
   0x7 LB: > { %s1309_s19 = sadd.s32 4294967295, %s1251_s18   ;;  %s792_s20 = sadd.s32 4294967294, %s1251_s18   ;;  %s1251_s18 = sphi %s1294_s18, %s1743_s18   ;;  %s1247_s17 = sphi %s1292_s17, %s1742_s17   ;;  %s1243_s16 = sphi %s1290_s16, %s1741_s16   ;;  %s1239_s15 = sphi %s1288_s15, %s1740_s15  }
   0x8   : > { %p43_p0 = scmp.ne.s32.totalorder %s1243_s16, %s1239_s15  ;;  %p1716_p1 = scmp.eq.s32.totalorder %s1309_s19, 0 }
   0x9   : > { %p94_p3 = scmp.eq.s32.totalorder %s792_s20, 1  ;;  %p793_p5 = scmp.ge.s32.totalorder %s1251_s18, 1 }
   0xa   : > { %p1318_p4 = por %p1716_p1, %p43_p0  ;;  %p143_p7 = scmp.lt.s32.totalorder %s1251_s18, 3 }
   0xb   : > { %p1323_p6 = por %p94_p3, %p43_p0  ;;  %s1253_s24 = smov [#allocation5]  }
   0xc   : > { %s1719_s21 = scalar_select %p1318_p4, 1, 0 }
   0xd   : > { %s1720_s22 = scalar_select %p1323_p6, 1, 0 }
   0xe   : > { %p1329_p9 = pnand %p793_p5, %p143_p7  ;;  %s155_s25 = sshll.u32 %s1253_s24, 4  ;;  %s1333_s25 = int_to_ptr.vmem [resolvable:$true] %s155_s25 }
   0xf   : > { %s1345_s27 = sadd.s32 1, %s1251_s18   ;;  %s30_s28 = sadd.s32 1, %s1247_s17 }
  0x10   : > { %s1721_s23 = scalar_select %p1329_p9, 1, 0 }
  0x11   : > { %p1007_p10 = pneg %p1329_p9  ;;  %s27_s29 = ssub.s32 %s1251_s18, %s1345_s27 }
  0x12   : > { %s1067_s6 = scalar_lea.hbm %s1712_s1, 2048 }
  0x13   : > { %p1340_p12 = pnand %p1007_p10, %p1716_p1  ;;  %p1068_p13 = scmp.ne.s32.totalorder %s1712_s1, %s1067_s6 }
  0x14   : > { %p1074_p7 = scmp.lt.u32.totalorder %s1067_s6, %s1712_s1 }
  0x15   : > { %p1069_p0 = pneg %p1340_p12 }
  0x17   : > { %p1070_p3 = pnand %p1069_p0, %p1068_p13 }
  0x19   : > { %p1071_p5 = pneg %p1070_p3 }
  0x1b   : > { %p1076_p10 = pnand %p1074_p7, %p1071_p5 }
  0x1d   : > { %1079 = shalt.err (!%p1076_p10)
}
  0x1e   : > { %s1080_s11 = scalar_lea.vmem %s1333_s25, 2048  ;;  %p1088_p2 = scmp.lt.s32.totalorder %s1333_s25, %s1333_s25 }
  0x1f   : > { %p1081_p11 = scmp.ne.s32.totalorder %s1333_s25, %s1080_s11  ;;  %p1089_p6 = scmp.lt.s32.totalorder %s1080_s11, %s1080_s11 }
  0x21   : > { %p1083_p8 = pnand %p1081_p11, %p1069_p0  ;;  %p1090_p4 = por %p1089_p6, %p1088_p2 }
  0x23   : > { %p1084_p1 = pneg %p1083_p8 }
  0x25   : > { %p1091_p9 = pnand %p1090_p4, %p1084_p1 }
  0x27   : > { %1094 = shalt.err (!%p1091_p9)
}
  0x28   : > { %s1254_s12 = smov 128   ;;  %s1255_s13 = smov 8  }
  0x29   : > { %1010 = dma.hbm_to_vmem [thread:$0]  (!%p1340_p12), %s1712_s1, 2048, %s1333_s25, [#allocation6], %s1254_s12, %s1254_s12, %s1255_s13  }
  0x2a   : > { %p28_p1 = scmp.eq.s32.totalorder %s27_s29, 0  ;;  %p37_p2 = scmp.ne.s32.totalorder %s1247_s17, %s1243_s16 }
  0x2b   : > { %p38_p4 = scmp.eq.s32.totalorder %s1251_s18, 0  ;;  %p1020_p6 = scmp.lt.s32.totalorder %s1251_s18, 2 }
  0x2c   : > { %s1379_s24 = scalar_select %p28_p1, %s1247_s17, %s30_s28  }
  0x2d   : > { %p39_p8 = por %p38_p4, %p37_p2  ;;  %p1723_p9 = scmp.eq.s32.totalorder %s1309_s19, 1 }
  0x2e   : > { %s169_s26 = sand.u32 1, %s1247_s17   ;;  %s813_s5 = sshll.u32 %s1251_s18, 12 }
  0x2f   : > { %p1383_p11 = por %p1723_p9, %p37_p2  ;;  %s796_s6 = sshll.u32 %s169_s26, 8 }
  0x30   : > { %s1392_s9 = scalar_lea.hbm %s1711_s0, %s813_s5  ;;  %s173_s25 = scalar_lea.vmem [#allocation2], %s796_s6 }
  0x31   : > { %s180_s28 = sshll.u32 %s173_s25, 4  ;;  %p1394_p12 = pnand %p1020_p6, %p39_p8  ;;  %s1398_s28 = int_to_ptr.vmem [resolvable:$true] %s180_s28 }
  0x32   : > { %s1400_s10 = scalar_lea.sflag [#allocation3], %s169_s26  ;;  %s1095_s11 = scalar_lea.hbm %s1392_s9, 4096 }
  0x33   : > { %p1096_p13 = scmp.ne.s32.totalorder %s1392_s9, %s1095_s11  ;;  %p1097_p0 = pneg %p1394_p12 }
  0x34   : > { %s1100_s5 = scalar_lea.hbm %s1711_s0, 8192  ;;  %p1101_p7 = scmp.lt.u32.totalorder %s1392_s9, %s1711_s0 }
  0x35   : > { %p1098_p3 = pnand %p1097_p0, %p1096_p13  ;;  %p1102_p10 = scmp.lt.u32.totalorder %s1100_s5, %s1095_s11 }
  0x36   : > { %p1104_p2 = scmp.lt.u32.totalorder %s1095_s11, %s1392_s9 }
  0x37   : > { %p1099_p5 = pneg %p1098_p3  ;;  %p1103_p1 = por %p1102_p10, %p1101_p7 }
  0x39   : > { %p1105_p4 = por %p1104_p2, %p1103_p1 }
  0x3b   : > { %p1106_p6 = pnand %p1105_p4, %p1099_p5 }
  0x3d   : > { %1109 = shalt.err (!%p1106_p6)
}
  0x3e   : > { %s1110_s26 = scalar_lea.vmem %s1398_s28, 4096  ;;  %s1256_s8 = smov [#allocation2]  }
  0x3f   : > { %p1111_p8 = scmp.ne.s32.totalorder %s1398_s28, %s1110_s26  ;;  %s1115_s25 = sshll.u32 %s1256_s8, 4  ;;  %s1116_s25 = int_to_ptr.vmem [resolvable:$false] %s1115_s25 }
  0x40   : > { %s1117_s14 = scalar_lea.vmem %s1116_s25, 8192  ;;  %p1118_p3 = scmp.lt.s32.totalorder %s1398_s28, %s1116_s25 }
  0x41   : > { %p1113_p9 = pnand %p1111_p8, %p1097_p0  ;;  %p1119_p7 = scmp.lt.s32.totalorder %s1117_s14, %s1110_s26 }
  0x43   : > { %p1114_p13 = pneg %p1113_p9  ;;  %p1120_p10 = por %p1119_p7, %p1118_p3 }
  0x45   : > { %p1121_p1 = pnand %p1120_p10, %p1114_p13 }
  0x47   : > { %1124 = shalt.err (!%p1121_p1)
}
  0x48   : > { %1014 = dma.hbm_to_vmem [thread:$0]  (!%p1394_p12), %s1392_s9, 4096, %s1398_s28, %s1400_s10, %s1254_s12, %s1254_s12, %s1255_s13  }
  0x49   : > { %p1726_p0 = scmp.ne.s32.totalorder %s1721_s23, 0 }
  0x4a   : > { %s1434_s11 = sand.u32 (!%p1726_p0), 1, %s1243_s16   ;;  %p1727_p5 = scmp.ne.s32.totalorder (!%p1726_p0), %s1719_s21, 0 }
  0x4b   : > { %192 = sbr.rel (%p1726_p0) target bundleno = 471 (0x1d7), region = 28  ;;  %s800_s20 = sshll.u32 (!%p1726_p0), %s1434_s11, 8 }
  0x4c   : > { %s195_s5 = scalar_lea.sflag (!%p1726_p0), [#allocation3], %s1434_s11  ;;  %s1438_s6 = scalar_lea.vmem (!%p1726_p0), [#allocation2], %s800_s20 }
  0x52   : > { %1222 = dma.done.wait (%p1727_p5), %s195_s5, 4096  }
  0x53   : > { %1224 = vsyncadd (%p1727_p5), %s195_s5, 4294963200  ;;  %p1728_p12 = scmp.eq.s32.totalorder %s1309_s19, 0 }
  0x55   : > { %1226 = dma.done.wait (%p1728_p12), [#allocation6], 2048   ;;  %p1729_p2 = pmov %p1728_p12 }
  0x56   : > { %s1448_s23 = scalar_lea.vmem [#allocation7], %s800_s20  ;;  %p1730_p4 = scmp.ne.s32.totalorder %s1309_s19, 0 }
  0x57   : > { %1228 = vsyncadd (%p1729_p2), [#allocation6], 4294965248  ;;  %v1257_v0 = vmov (!%p1730_p4), 0.0  }
  0x58   : > { %232 = sbr.rel (%p1730_p4) target bundleno = 95 (0x5f), region = 40  ;;  %233 = vst [vmem:[#allocation8] sm:$0x1] (!%p1730_p4), %v1257_v0  ;;  %234 = vst [vmem:[#allocation10] sm:$0x1] (!%p1730_p4), %v1257_v0 }
  0x5f PF: > { %v267_v1 = vld [vmem:[#allocation5] sm:$0xff]  ;;  %v268_v2 = vld [vmem:[#allocation5 + $0x8] sm:$0xff]  ;;  %v269_v3 = vld [vmem:[#allocation5 + $0x10] sm:$0xff]  ;;  %s814_s21 = sshll.u32 %s1309_s19, 12  ;;  %s666_s12 = sshll.u32 %s1448_s23, 4  ;;  %s1561_s12 = int_to_ptr.vmem [resolvable:$true] %s666_s12 }
  0x60   : > { %v943_v4 = vpack.c.bf16 %v268_v2, %v267_v1  ;;  %v270_v5 = vld [vmem:[#allocation5 + $0x18] sm:$0xff]  ;;  %v271_v7 = vld [vmem:[#allocation5 + $0x20] sm:$0xff]  ;;  %v272_v8 = vld [vmem:[#allocation5 + $0x28] sm:$0xff]  ;;  %s1559_s28 = scalar_lea.hbm %s1713_s2, %s814_s21  ;;  %s653_s29 = scalar_lea.sflag [#allocation4], %s1434_s11 }
  0x61   : > { %v947_v6 = vpack.c.bf16 %v270_v5, %v269_v3  ;;  %v951_v9 = vpack.c.bf16 %v272_v8, %v271_v7  ;;  %v235_v10 = vld [vmem:[%s1438_s6] sm:$0xff]  ;;  %v273_v11 = vld [vmem:[#allocation5 + $0x30] sm:$0xff]  ;;  %v274_v12 = vld [vmem:[#allocation5 + $0x38] sm:$0xff]  ;;  %s1125_s10 = scalar_lea.vmem %s1561_s12, 4096  ;;  %s1258_s7 = smov [#allocation7]  }
  0x62   : > { %944 = vmatprep.subr.bf16.mxu0 %v943_v4  ;;  %975 = vmatprep.subr.bf16.mxu1 %v943_v4  ;;  %v955_v13 = vpack.c.bf16 %v274_v12, %v273_v11  ;;  %v275_v14 = vld [vmem:[#allocation5 + $0x40] sm:$0xff]  ;;  %v276_v15 = vld [vmem:[#allocation5 + $0x48] sm:$0xff]  ;;  %v277_v18 = vld [vmem:[#allocation5 + $0x50] sm:$0xff]  ;;  %p1126_p6 = scmp.ne.s32.totalorder %s1561_s12, %s1125_s10  ;;  %s1129_s26 = sshll.u32 %s1258_s7, 4  ;;  %s1130_s26 = int_to_ptr.vmem [resolvable:$false] %s1129_s26 }
  0x63   : > { %946 = vmatpush3.bf16.msra.mxu0 %v943_v4  ;;  %983 = vmatpush3.bf16.msra.mxu1 %v943_v4  ;;  %v251_v16 = vld [vmem:[%s1438_s6 + $0x80] sm:$0xff]  ;;  %v959_v17 = vpack.c.bf16 %v276_v15, %v275_v14  ;;  %v278_v19 = vld [vmem:[#allocation5 + $0x58] sm:$0xff]  ;;  %v280_v22 = vld [vmem:[#allocation5 + $0x68] sm:$0xff]  ;;  %s1131_s8 = scalar_lea.vmem %s1130_s26, 8192  ;;  %p1132_p13 = scmp.lt.s32.totalorder %s1561_s12, %s1130_s26 }
  0x64   : > { %948 = vmatprep.subr.bf16.mxu0 %v947_v6  ;;  %976 = vmatprep.subr.bf16.mxu1 %v947_v6  ;;  %v963_v20 = vpack.c.bf16 %v278_v19, %v277_v18  ;;  %v279_v21 = vld [vmem:[#allocation5 + $0x60] sm:$0xff]  ;;  %v281_v24 = vld [vmem:[#allocation5 + $0x70] sm:$0xff]  ;;  %v282_v25 = vld [vmem:[#allocation5 + $0x78] sm:$0xff]  ;;  %p1127_p8 = pnand %p1126_p6, %p1383_p11  ;;  %p1133_p3 = scmp.lt.s32.totalorder %s1131_s8, %s1125_s10 }
  0x65   : > { %895 = vmatprep.mubr.f32.mxu0 %v235_v10  ;;  %919 = vmatprep.mubr.f32.mxu1 %v251_v16  ;;  %v967_v23 = vpack.c.bf16 %v280_v22, %v279_v21  ;;  %v971_v26 = vpack.c.bf16 %v282_v25, %v281_v24  ;;  %v236_v27 = vld [vmem:[%s1438_s6 + $0x8] sm:$0xff]  ;;  %v237_v29 = vld [vmem:[%s1438_s6 + $0x10] sm:$0xff]  ;;  %v238_v31 = vld [vmem:[%s1438_s6 + $0x18] sm:$0xff] }
  0x66   : > { %v252_v28 = vld [vmem:[%s1438_s6 + $0x88] sm:$0xff]  ;;  %v253_v30 = vld [vmem:[%s1438_s6 + $0x90] sm:$0xff]  ;;  %v254_v32 = vld [vmem:[%s1438_s6 + $0x98] sm:$0xff]  ;;  %p1128_p9 = pneg %p1127_p8  ;;  %p1134_p7 = por %p1133_p3, %p1132_p13 }
  0x67   : > { %950 = vmatpush3.bf16.msra.mxu0 %v947_v6  ;;  %984 = vmatpush3.bf16.msra.mxu1 %v947_v6  ;;  %v239_v33 = vld [vmem:[%s1438_s6 + $0x20] sm:$0xff]  ;;  %v240_v35 = vld [vmem:[%s1438_s6 + $0x28] sm:$0xff]  ;;  %v241_v37 = vld [vmem:[%s1438_s6 + $0x30] sm:$0xff] }
  0x68   : > { %952 = vmatprep.subr.bf16.mxu0 %v951_v9  ;;  %977 = vmatprep.subr.bf16.mxu1 %v951_v9  ;;  %v255_v34 = vld [vmem:[%s1438_s6 + $0xa0] sm:$0xff]  ;;  %v256_v36 = vld [vmem:[%s1438_s6 + $0xa8] sm:$0xff]  ;;  %v257_v38 = vld [vmem:[%s1438_s6 + $0xb0] sm:$0xff]  ;;  %p1135_p10 = pnand %p1134_p7, %p1128_p9 }
  0x69   : > { %v242_v39 = vld [vmem:[%s1438_s6 + $0x38] sm:$0xff]  ;;  %v243_v41 = vld [vmem:[%s1438_s6 + $0x40] sm:$0xff]  ;;  %v244_v43 = vld [vmem:[%s1438_s6 + $0x48] sm:$0xff] }
  0x6a   : > { %v258_v40 = vld [vmem:[%s1438_s6 + $0xb8] sm:$0xff]  ;;  %v259_v42 = vld [vmem:[%s1438_s6 + $0xc0] sm:$0xff]  ;;  %v260_v44 = vld [vmem:[%s1438_s6 + $0xc8] sm:$0xff] }
  0x6b   : > { %954 = vmatpush3.bf16.msra.mxu0 %v951_v9  ;;  %985 = vmatpush3.bf16.msra.mxu1 %v951_v9  ;;  %v245_v45 = vld [vmem:[%s1438_s6 + $0x50] sm:$0xff]  ;;  %v246_v47 = vld [vmem:[%s1438_s6 + $0x58] sm:$0xff]  ;;  %v247_v49 = vld [vmem:[%s1438_s6 + $0x60] sm:$0xff] }
  0x6c   : > { %956 = vmatprep.subr.bf16.mxu0 %v955_v13  ;;  %978 = vmatprep.subr.bf16.mxu1 %v955_v13  ;;  %v261_v46 = vld [vmem:[%s1438_s6 + $0xd0] sm:$0xff]  ;;  %v262_v48 = vld [vmem:[%s1438_s6 + $0xd8] sm:$0xff]  ;;  %v263_v50 = vld [vmem:[%s1438_s6 + $0xe0] sm:$0xff] }
  0x6d   : > { %v248_v51 = vld [vmem:[%s1438_s6 + $0x68] sm:$0xff]  ;;  %v249_v53 = vld [vmem:[%s1438_s6 + $0x70] sm:$0xff]  ;;  %v250_v55 = vld [vmem:[%s1438_s6 + $0x78] sm:$0xff] }
  0x6e   : > { %v264_v52 = vld [vmem:[%s1438_s6 + $0xe8] sm:$0xff]  ;;  %v265_v54 = vld [vmem:[%s1438_s6 + $0xf0] sm:$0xff]  ;;  %v266_v56 = vld [vmem:[%s1438_s6 + $0xf8] sm:$0xff] }
  0x6f   : > { %958 = vmatpush3.bf16.msra.mxu0 %v955_v13  ;;  %986 = vmatpush3.bf16.msra.mxu1 %v955_v13 }
  0x70   : > { %960 = vmatprep.subr.bf16.mxu0 %v959_v17  ;;  %979 = vmatprep.subr.bf16.mxu1 %v959_v17 }
  0x73   : > { %962 = vmatpush3.bf16.msra.mxu0 %v959_v17  ;;  %987 = vmatpush3.bf16.msra.mxu1 %v959_v17 }
  0x74   : > { %964 = vmatprep.subr.bf16.mxu0 %v963_v20  ;;  %980 = vmatprep.subr.bf16.mxu1 %v963_v20 }
  0x77   : > { %966 = vmatpush3.bf16.msra.mxu0 %v963_v20  ;;  %988 = vmatpush3.bf16.msra.mxu1 %v963_v20 }
  0x78   : > { %968 = vmatprep.subr.bf16.mxu0 %v967_v23  ;;  %981 = vmatprep.subr.bf16.mxu1 %v967_v23 }
  0x7b   : > { %970 = vmatpush3.bf16.msra.mxu0 %v967_v23  ;;  %989 = vmatpush3.bf16.msra.mxu1 %v967_v23 }
  0x7c   : > { %972 = vmatprep.subr.bf16.mxu0 %v971_v26  ;;  %982 = vmatprep.subr.bf16.mxu1 %v971_v26 }
  0x7f   : > { %974 = vmatpush3.bf16.msra.mxu0 %v971_v26  ;;  %990 = vmatpush3.bf16.msra.mxu1 %v971_v26 }
  0x82   : > { %896 = vmatmul.mubr.f32.vlgmr.msra.gmra.mrb[0].mxu0 %v236_v27  ;;  %920 = vmatmul.mubr.f32.vlgmr.msra.gmra.mrb[0].mxu1 %v252_v28 }
  0x83   : > { %898 = vmatprep.mubr.f32.mxu0 %v237_v29  ;;  %922 = vmatprep.mubr.f32.mxu1 %v253_v30 }
  0x86   : > { %899 = vmatmul.mubr.f32.gmra.mrb[2].mxu0 %v238_v31  ;;  %923 = vmatmul.mubr.f32.gmra.mrb[2].mxu1 %v254_v32 }
  0x87   : > { %901 = vmatprep.mubr.f32.mxu0 %v239_v33  ;;  %925 = vmatprep.mubr.f32.mxu1 %v255_v34 }
  0x8a   : > { %902 = vmatmul.mubr.f32.gmra.mrb[4].mxu0 %v240_v35  ;;  %926 = vmatmul.mubr.f32.gmra.mrb[4].mxu1 %v256_v36 }
  0x8b   : > { %904 = vmatprep.mubr.f32.mxu0 %v241_v37  ;;  %928 = vmatprep.mubr.f32.mxu1 %v257_v38 }
  0x8e   : > { %905 = vmatmul.mubr.f32.gmra.mrb[6].mxu0 %v242_v39  ;;  %929 = vmatmul.mubr.f32.gmra.mrb[6].mxu1 %v258_v40 }
  0x8f   : > { %907 = vmatprep.mubr.f32.mxu0 %v243_v41  ;;  %931 = vmatprep.mubr.f32.mxu1 %v259_v42 }
  0x92   : > { %908 = vmatmul.mubr.f32.gmra.mrb[8].mxu0 %v244_v43  ;;  %932 = vmatmul.mubr.f32.gmra.mrb[8].mxu1 %v260_v44 }
  0x93   : > { %910 = vmatprep.mubr.f32.mxu0 %v245_v45  ;;  %934 = vmatprep.mubr.f32.mxu1 %v261_v46 }
  0x96   : > { %911 = vmatmul.mubr.f32.gmra.mrb[10].mxu0 %v246_v47  ;;  %935 = vmatmul.mubr.f32.gmra.mrb[10].mxu1 %v262_v48 }
  0x97   : > { %913 = vmatprep.mubr.f32.mxu0 %v247_v49  ;;  %937 = vmatprep.mubr.f32.mxu1 %v263_v50 }
  0x9a   : > { %914 = vmatmul.mubr.f32.gmra.mrb[12].mxu0 %v248_v51  ;;  %938 = vmatmul.mubr.f32.gmra.mrb[12].mxu1 %v264_v52 }
  0x9b   : > { %916 = vmatprep.mubr.f32.mxu0 %v249_v53  ;;  %940 = vmatprep.mubr.f32.mxu1 %v265_v54 }
  0x9e   : > { %917 = vmatmul.mubr.f32.gmra.mrb[14].mxu0 %v250_v55  ;;  %941 = vmatmul.mubr.f32.gmra.mrb[14].mxu1 %v266_v56 }
 0x155   : > { %v897_v57 = vpop.f32.mrb[0].mxu0  ;;  %v1484_v58 = vpop.f32.mrb[0].mxu1 }
 0x156   : > { %509 = vst [vmem:[%s1448_s23 + $0x8] sm:$0xff] %v897_v57  ;;  %v582_v59 = vmul.f32 %v897_v57, %v897_v57  ;;  %v349_v60 = vpop.f32.mrb[1].mxu0  ;;  %525 = vst [vmem:[%s1448_s23 + $0x88] sm:$0xff] %v1484_v58  ;;  %v1489_v61 = vpop.f32.mrb[1].mxu1 }
 0x157   : > { %508 = vst [vmem:[%s1448_s23] sm:$0xff] %v349_v60  ;;  %v541_v62 = vadd.f32 %v897_v57, %v349_v60  ;;  %v581_v63 = vmul.f32 %v349_v60, %v349_v60  ;;  %524 = vst [vmem:[%s1448_s23 + $0x80] sm:$0xff] %v1489_v61 }
 0x159   : > { %v613_v0 = vadd.f32 %v582_v59, %v581_v63  ;;  %v900_v1 = vpop.f32.mrb[2].mxu0  ;;  %v1494_v2 = vpop.f32.mrb[2].mxu1 }
 0x15a   : > { %511 = vst [vmem:[%s1448_s23 + $0x18] sm:$0xff] %v900_v1  ;;  %v359_v3 = vpop.f32.mrb[3].mxu0  ;;  %527 = vst [vmem:[%s1448_s23 + $0x98] sm:$0xff] %v1494_v2  ;;  %v1499_v4 = vpop.f32.mrb[3].mxu1  ;;  %v584_v7 = vmul.f32 %v900_v1, %v900_v1 }
 0x15b   : > { %510 = vst [vmem:[%s1448_s23 + $0x10] sm:$0xff] %v359_v3  ;;  %v542_v5 = vadd.f32 %v541_v62, %v359_v3  ;;  %v583_v6 = vmul.f32 %v359_v3, %v359_v3  ;;  %526 = vst [vmem:[%s1448_s23 + $0x90] sm:$0xff] %v1499_v4 }
 0x15d   : > { %v614_v8 = vadd.f32 %v613_v0, %v583_v6  ;;  %v903_v9 = vpop.f32.mrb[4].mxu0  ;;  %v543_v10 = vadd.f32 %v900_v1, %v542_v5  ;;  %v1504_v11 = vpop.f32.mrb[4].mxu1 }
 0x15e   : > { %513 = vst [vmem:[%s1448_s23 + $0x28] sm:$0xff] %v903_v9  ;;  %v369_v12 = vpop.f32.mrb[5].mxu0  ;;  %529 = vst [vmem:[%s1448_s23 + $0xa8] sm:$0xff] %v1504_v11  ;;  %v1509_v13 = vpop.f32.mrb[5].mxu1  ;;  %v586_v17 = vmul.f32 %v903_v9, %v903_v9 }
 0x15f   : > { %512 = vst [vmem:[%s1448_s23 + $0x20] sm:$0xff] %v369_v12  ;;  %v544_v14 = vadd.f32 %v543_v10, %v369_v12  ;;  %v585_v15 = vmul.f32 %v369_v12, %v369_v12  ;;  %v615_v16 = vadd.f32 %v614_v8, %v584_v7  ;;  %528 = vst [vmem:[%s1448_s23 + $0xa0] sm:$0xff] %v1509_v13 }
 0x161   : > { %v616_v18 = vadd.f32 %v615_v16, %v585_v15  ;;  %v906_v19 = vpop.f32.mrb[6].mxu0  ;;  %v545_v20 = vadd.f32 %v903_v9, %v544_v14  ;;  %v1514_v21 = vpop.f32.mrb[6].mxu1 }
 0x162   : > { %515 = vst [vmem:[%s1448_s23 + $0x38] sm:$0xff] %v906_v19  ;;  %v379_v22 = vpop.f32.mrb[7].mxu0  ;;  %531 = vst [vmem:[%s1448_s23 + $0xb8] sm:$0xff] %v1514_v21  ;;  %v1519_v23 = vpop.f32.mrb[7].mxu1  ;;  %v588_v27 = vmul.f32 %v906_v19, %v906_v19 }
 0x163   : > { %514 = vst [vmem:[%s1448_s23 + $0x30] sm:$0xff] %v379_v22  ;;  %v546_v24 = vadd.f32 %v545_v20, %v379_v22  ;;  %v587_v25 = vmul.f32 %v379_v22, %v379_v22  ;;  %v617_v26 = vadd.f32 %v616_v18, %v586_v17  ;;  %530 = vst [vmem:[%s1448_s23 + $0xb0] sm:$0xff] %v1519_v23 }
 0x165   : > { %v618_v28 = vadd.f32 %v617_v26, %v587_v25  ;;  %v909_v29 = vpop.f32.mrb[8].mxu0  ;;  %v547_v30 = vadd.f32 %v906_v19, %v546_v24  ;;  %v1524_v31 = vpop.f32.mrb[8].mxu1 }
 0x166   : > { %517 = vst [vmem:[%s1448_s23 + $0x48] sm:$0xff] %v909_v29  ;;  %v389_v32 = vpop.f32.mrb[9].mxu0  ;;  %533 = vst [vmem:[%s1448_s23 + $0xc8] sm:$0xff] %v1524_v31  ;;  %v1529_v33 = vpop.f32.mrb[9].mxu1  ;;  %v590_v37 = vmul.f32 %v909_v29, %v909_v29 }
 0x167   : > { %516 = vst [vmem:[%s1448_s23 + $0x40] sm:$0xff] %v389_v32  ;;  %v548_v34 = vadd.f32 %v547_v30, %v389_v32  ;;  %v589_v35 = vmul.f32 %v389_v32, %v389_v32  ;;  %v619_v36 = vadd.f32 %v618_v28, %v588_v27  ;;  %532 = vst [vmem:[%s1448_s23 + $0xc0] sm:$0xff] %v1529_v33 }
 0x169   : > { %v620_v38 = vadd.f32 %v619_v36, %v589_v35  ;;  %v912_v39 = vpop.f32.mrb[10].mxu0  ;;  %v549_v40 = vadd.f32 %v909_v29, %v548_v34  ;;  %v1534_v41 = vpop.f32.mrb[10].mxu1 }
 0x16a   : > { %519 = vst [vmem:[%s1448_s23 + $0x58] sm:$0xff] %v912_v39  ;;  %v399_v42 = vpop.f32.mrb[11].mxu0  ;;  %535 = vst [vmem:[%s1448_s23 + $0xd8] sm:$0xff] %v1534_v41  ;;  %v1539_v43 = vpop.f32.mrb[11].mxu1  ;;  %v592_v47 = vmul.f32 %v912_v39, %v912_v39 }
 0x16b   : > { %518 = vst [vmem:[%s1448_s23 + $0x50] sm:$0xff] %v399_v42  ;;  %v550_v44 = vadd.f32 %v549_v40, %v399_v42  ;;  %v591_v45 = vmul.f32 %v399_v42, %v399_v42  ;;  %v621_v46 = vadd.f32 %v620_v38, %v590_v37  ;;  %534 = vst [vmem:[%s1448_s23 + $0xd0] sm:$0xff] %v1539_v43 }
 0x16d   : > { %v622_v48 = vadd.f32 %v621_v46, %v591_v45  ;;  %v915_v49 = vpop.f32.mrb[12].mxu0  ;;  %v551_v50 = vadd.f32 %v912_v39, %v550_v44  ;;  %v1544_v51 = vpop.f32.mrb[12].mxu1 }
 0x16e   : > { %521 = vst [vmem:[%s1448_s23 + $0x68] sm:$0xff] %v915_v49  ;;  %v409_v52 = vpop.f32.mrb[13].mxu0  ;;  %537 = vst [vmem:[%s1448_s23 + $0xe8] sm:$0xff] %v1544_v51  ;;  %v1551_v53 = vpop.f32.mrb[13].mxu1  ;;  %v594_v57 = vmul.f32 %v915_v49, %v915_v49 }
 0x16f   : > { %520 = vst [vmem:[%s1448_s23 + $0x60] sm:$0xff] %v409_v52  ;;  %v552_v54 = vadd.f32 %v551_v50, %v409_v52  ;;  %v593_v55 = vmul.f32 %v409_v52, %v409_v52  ;;  %v623_v56 = vadd.f32 %v622_v48, %v592_v47  ;;  %536 = vst [vmem:[%s1448_s23 + $0xe0] sm:$0xff] %v1551_v53 }
 0x171   : > { %v624_v59 = vadd.f32 %v623_v56, %v593_v55  ;;  %v918_v60 = vpop.f32.mrb[14].mxu0  ;;  %v553_v62 = vadd.f32 %v915_v49, %v552_v54  ;;  %v1563_v63 = vpop.f32.mrb[14].mxu1 }
 0x172   : > { %523 = vst [vmem:[%s1448_s23 + $0x78] sm:$0xff] %v918_v60  ;;  %v419_v0 = vpop.f32.mrb[15].mxu0  ;;  %539 = vst [vmem:[%s1448_s23 + $0xf8] sm:$0xff] %v1563_v63  ;;  %v1568_v1 = vpop.f32.mrb[15].mxu1 }
 0x173   : > { %522 = vst [vmem:[%s1448_s23 + $0x70] sm:$0xff] %v419_v0  ;;  %v554_v3 = vadd.f32 %v553_v62, %v419_v0  ;;  %v595_v5 = vmul.f32 %v419_v0, %v419_v0  ;;  %v625_v6 = vadd.f32 %v624_v59, %v594_v57  ;;  %538 = vst [vmem:[%s1448_s23 + $0xf0] sm:$0xff] %v1568_v1 }
 0x174   : > { %1138 = shalt.err (!%p1135_p10)
}
 0x175   : > { %s1139_s25 = scalar_lea.hbm %s1559_s28, 4096  ;;  %s1143_s5 = scalar_lea.hbm %s1713_s2, 8192 }
 0x176   : > { %p1140_p1 = scmp.ne.s32.totalorder %s1559_s28, %s1139_s25  ;;  %p1144_p12 = scmp.lt.u32.totalorder %s1559_s28, %s1713_s2 }
 0x177   : > { %p1145_p2 = scmp.lt.u32.totalorder %s1143_s5, %s1139_s25  ;;  %p1147_p6 = scmp.lt.u32.totalorder %s1139_s25, %s1559_s28 }
 0x178   : > { %p1141_p0 = pnand %p1140_p1, %p1383_p11 }
 0x179   : > { %p1146_p4 = por %p1145_p2, %p1144_p12 }
 0x17a   : > { %p1142_p5 = pneg %p1141_p0 }
 0x17b   : > { %p1148_p8 = por %p1147_p6, %p1146_p4 }
 0x17d   : > { %p1149_p9 = pnand %p1148_p8, %p1142_p5 }
 0x17f   : > { %1152 = shalt.err (!%p1149_p9)
}
 0x180   : > { %s1259_s21 = smov 128   ;;  %s1260_s13 = smov 8   ;;  %v596_v7 = vmul.f32 %v918_v60, %v918_v60  ;;  %v555_v8 = vadd.f32 %v918_v60, %v554_v3  ;;  %v626_v9 = vadd.f32 %v625_v6, %v595_v5  ;;  %v597_v10 = vmul.f32 %v1489_v61, %v1489_v61  ;;  %v540_v6 = vld [vmem:[#allocation8] sm:$0x1] }
 0x181   : > { %997 = dma.vmem_to_hbm [thread:$0]  (%p1383_p11), %s1561_s12, 4096, %s1559_s28, %s653_s29, %s1259_s21, %s1259_s21, %s1260_s13   ;;  %v598_v15 = vmul.f32 %v1484_v58, %v1484_v58  ;;  %v599_v18 = vmul.f32 %v1499_v4, %v1499_v4  ;;  %v600_v22 = vmul.f32 %v1494_v2, %v1494_v2 }
 0x182   : > { %v627_v12 = vadd.f32 %v626_v9, %v596_v7  ;;  %v556_v14 = vadd.f32 %v555_v8, %v1489_v61  ;;  %v601_v61 = vmul.f32 %v1509_v13, %v1509_v13  ;;  %s1261_s30 = smov [#allocation8]   ;;  %v580_v8 = vld [vmem:[#allocation10] sm:$0x1]  ;;  %s1262_s12 = smov [#allocation10]  }
 0x183   : > { %s680_s11 = sshll.u32 %s1261_s30, 4  ;;  %s691_s9 = sshll.u32 %s1262_s12, 4  ;;  %s681_s11 = int_to_ptr.vmem [resolvable:$true] %s680_s11  ;;  %s1645_s9 = int_to_ptr.vmem [resolvable:$true] %s691_s9 }
 0x184   : > { %v628_v16 = vadd.f32 %v627_v12, %v597_v10  ;;  %v557_v17 = vadd.f32 %v1484_v58, %v556_v14  ;;  %v602_v58 = vmul.f32 %v1504_v11, %v1504_v11  ;;  %s1153_s28 = scalar_lea.vmem %s681_s11, 16  ;;  %p1731_p13 = scmp.eq.s32.totalorder %s1309_s19, 1 }
 0x185   : > { %p1154_p11 = scmp.ne.s32.totalorder %s681_s11, %s1153_s28  ;;  %s1159_s29 = scalar_lea.vmem %s681_s11, 32 }
 0x186   : > { %v558_v19 = vadd.f32 %v557_v17, %v1499_v4  ;;  %v629_v20 = vadd.f32 %v628_v16, %v598_v15  ;;  %v603_v4 = vmul.f32 %v1519_v23, %v1519_v23  ;;  %p1160_p10 = scmp.lt.s32.totalorder %s681_s11, %s681_s11  ;;  %p1161_p1 = scmp.lt.s32.totalorder %s1159_s29, %s1153_s28 }
 0x187   : > { %p1155_p3 = pnand %p1154_p11, %p1731_p13 }
 0x188   : > { %v630_v24 = vadd.f32 %v629_v20, %v599_v18  ;;  %v559_v25 = vadd.f32 %v1494_v2, %v558_v19  ;;  %v604_v2 = vmul.f32 %v1514_v21, %v1514_v21  ;;  %p1162_p0 = por %p1161_p1, %p1160_p10 }
 0x189   : > { %p1156_p7 = pneg %p1155_p3 }
 0x18a   : > { %v560_v26 = vadd.f32 %v559_v25, %v1509_v13  ;;  %v631_v27 = vadd.f32 %v630_v24, %v600_v22  ;;  %v605_v13 = vmul.f32 %v1529_v33, %v1529_v33 }
 0x18b   : > { %p1163_p5 = pnand %p1162_p0, %p1156_p7 }
 0x18c   : > { %v632_v28 = vadd.f32 %v631_v27, %v601_v61  ;;  %v561_v29 = vadd.f32 %v1504_v11, %v560_v26  ;;  %v606_v11 = vmul.f32 %v1524_v31, %v1524_v31 }
 0x18e   : > { %v562_v30 = vadd.f32 %v561_v29, %v1519_v23  ;;  %v633_v32 = vadd.f32 %v632_v28, %v602_v58  ;;  %v607_v23 = vmul.f32 %v1539_v43, %v1539_v43 }
 0x190   : > { %v634_v34 = vadd.f32 %v633_v32, %v603_v4  ;;  %v563_v35 = vadd.f32 %v1514_v21, %v562_v30  ;;  %v608_v21 = vmul.f32 %v1534_v41, %v1534_v41 }
 0x192   : > { %v564_v36 = vadd.f32 %v563_v35, %v1529_v33  ;;  %v635_v37 = vadd.f32 %v634_v34, %v604_v2  ;;  %v609_v33 = vmul.f32 %v1551_v53, %v1551_v53 }
 0x194   : > { %v636_v38 = vadd.f32 %v635_v37, %v605_v13  ;;  %v565_v39 = vadd.f32 %v1524_v31, %v564_v36  ;;  %v610_v31 = vmul.f32 %v1544_v51, %v1544_v51 }
 0x196   : > { %v566_v40 = vadd.f32 %v565_v39, %v1539_v43  ;;  %v637_v42 = vadd.f32 %v636_v38, %v606_v11  ;;  %v611_v43 = vmul.f32 %v1568_v1, %v1568_v1 }
 0x198   : > { %v638_v44 = vadd.f32 %v637_v42, %v607_v23  ;;  %v567_v45 = vadd.f32 %v1534_v41, %v566_v40  ;;  %v612_v41 = vmul.f32 %v1563_v63, %v1563_v63 }
 0x19a   : > { %v568_v46 = vadd.f32 %v567_v45, %v1551_v53  ;;  %v639_v47 = vadd.f32 %v638_v44, %v608_v21 }
 0x19c   : > { %v640_v48 = vadd.f32 %v639_v47, %v609_v33  ;;  %v569_v49 = vadd.f32 %v1544_v51, %v568_v46 }
 0x19e   : > { %v570_v50 = vadd.f32 %v569_v49, %v1568_v1  ;;  %v641_v52 = vadd.f32 %v640_v48, %v610_v31 }
 0x1a0   : > { %v571_v54 = vadd.f32 %v1563_v63, %v570_v50  ;;  %v642_v55 = vadd.f32 %v641_v52, %v611_v43 }
 0x1a2   : > { %v572_v53 = vrot.slane %v571_v54, 4  ;;  %v643_v56 = vadd.f32 %v642_v55, %v612_v41 }
 0x1a4   : > { %v573_v57 = vadd.f32 %v572_v53, %v571_v54  ;;  %v644_v59 = vrot.slane %v643_v56, 4 }
 0x1a6   : > { %v574_v60 = vrot.slane %v573_v57, 2  ;;  %v645_v62 = vadd.f32 %v644_v59, %v643_v56 }
 0x1a8   : > { %v575_v0 = vadd.f32 %v574_v60, %v573_v57  ;;  %v646_v51 = vrot.slane %v645_v62, 2 }
 0x1aa   : > { %v576_v3 = vrot.slane %v575_v0, 1  ;;  %v647_v5 = vadd.f32 %v646_v51, %v645_v62 }
 0x1ac   : > { %v577_v1 = vadd.f32 %v576_v3, %v575_v0  ;;  %v648_v7 = vrot.slane %v647_v5, 1 }
 0x1ae   : > { %v578_v63 = vadd.f32 %v577_v1, %v540_v6  ;;  %v649_v9 = vadd.f32 %v648_v7, %v647_v5 }
 0x1b0   : > { %579 = vst [vmem:[#allocation8] sm:$0x1] %v578_v63  ;;  %v650_v10 = vadd.f32 %v649_v9, %v580_v8 }
 0x1b1   : > { %1166 = shalt.err (!%p1163_p5)
}
 0x1b2   : > { %s1167_s26 = scalar_lea.hbm %s1714_s3, 16  ;;  %p1732_p2 = pmov %p1731_p13 }
 0x1b3   : > { %p1168_p12 = scmp.ne.s32.totalorder %s1714_s3, %s1167_s26  ;;  %p1173_p8 = scmp.lt.u32.totalorder %s1167_s26, %s1714_s3 }
 0x1b5   : > { %p1169_p4 = pnand %p1168_p12, %p1732_p2 }
 0x1b7   : > { %p1170_p6 = pneg %p1169_p4 }
 0x1b9   : > { %p1175_p9 = pnand %p1173_p8, %p1170_p6 }
 0x1bb   : > { %1178 = shalt.err (!%p1175_p9)
}
 0x1bc   : > { %p1733_p11 = pmov %p1732_p2  ;;  %651 = vst [vmem:[#allocation10] sm:$0x1] %v650_v10  ;;  %s1179_s23 = scalar_lea.vmem %s1645_s9, 16 }
 0x1bd   : > { %p1180_p13 = scmp.ne.s32.totalorder %s1645_s9, %s1179_s23  ;;  %p1734_p3 = pmov %p1732_p2 }
 0x1be   : > { %999 = dma.vmem_to_hbm [thread:$0]  (%p1733_p11), %s681_s11, 16, %s1714_s3, [#allocation9]  }
 0x1bf   : > { %p1181_p7 = pnand %p1180_p13, %p1734_p3  ;;  %s1185_s21 = scalar_lea.vmem %s1645_s9, 32 }
 0x1c0   : > { %p1186_p1 = scmp.lt.s32.totalorder %s1645_s9, %s1645_s9  ;;  %p1187_p0 = scmp.lt.s32.totalorder %s1185_s21, %s1179_s23 }
 0x1c1   : > { %p1182_p10 = pneg %p1181_p7 }
 0x1c2   : > { %p1188_p5 = por %p1187_p0, %p1186_p1 }
 0x1c4   : > { %p1189_p12 = pnand %p1188_p5, %p1182_p10 }
 0x1c6   : > { %1192 = shalt.err (!%p1189_p12)
}
 0x1c7   : > { %s1193_s12 = scalar_lea.hbm %s1715_s4, 16  ;;  %p1735_p4 = pmov %p1734_p3 }
 0x1c8   : > { %p1194_p2 = scmp.ne.s32.totalorder %s1715_s4, %s1193_s12  ;;  %p1199_p9 = scmp.lt.u32.totalorder %s1193_s12, %s1715_s4 }
 0x1ca   : > { %p1195_p6 = pnand %p1194_p2, %p1735_p4 }
 0x1cc   : > { %p1196_p8 = pneg %p1195_p6 }
 0x1ce   : > { %p1201_p11 = pnand %p1199_p9, %p1196_p8 }
 0x1d0   : > { %1204 = shalt.err (!%p1201_p11)
}
 0x1d1   : > { %p1736_p13 = pmov %p1734_p3 }
 0x1d3   : > { %1001 = dma.vmem_to_hbm [thread:$0]  (%p1736_p13), %s1645_s9, 16, %s1715_s4, [#allocation9]  }
 0x1d4   : > { %1230 = dma.done.wait (%p1734_p3), [#allocation9], 32   ;;  %p1737_p7 = pmov %p1734_p3 }
 0x1d6   : > { %1232 = vsyncadd (%p1737_p7), [#allocation9], 4294967264 }
 0x1d7 PF: > { %s711_s8 = sand.u32 1, %s1239_s15   ;;  %p1738_p10 = scmp.ne.s32.totalorder %s1720_s22, 0 }
 0x1d8   : > { %p1739_p1 = scmp.ge.s32.totalorder %s1251_s18, 2  ;;  %s712_s25 = scalar_lea.sflag [#allocation4], %s711_s8 }
 0x1da   : > { %p1016_p0 = pnand %p1739_p1, %p1738_p10 }
 0x1dc   : > { %1234 = dma.done.wait (!%p1016_p0), %s712_s25, 4096  }
 0x1dd   : > { %1236 = vsyncadd (!%p1016_p0), %s712_s25, 4294963200  ;;  %p20_p5 = scmp.ge.s32.totalorder %s1345_s27, 4   ;;  %s1740_s15 = smov %s1243_s16 }
 0x1de   : > { %s1741_s16 = smov %s1247_s17  ;;  %s1742_s17 = smov %s1379_s24 }
 0x1df   : > { %s1743_s18 = smov %s1345_s27  ;;  %22 = sbr.rel (!%p20_p5) target bundleno = 7 (0x7), region = 97 }
 0x1e6   :  { %717 = vsyncpa [#allocation3], 1 }
 0x1e7   :  { %719 = vsyncpa [#allocation3 + $0x1], 1 }
 0x1e8   :  { %720 = vsyncpa [#allocation6], 1 }
 0x1e9   :  { %721 = vsyncpa [#allocation4], 1 }
 0x1ea   :  { %723 = vsyncpa [#allocation4 + $0x1], 1 }
 0x1eb   :  { %724 = vsyncpa [#allocation9], 1 }

</bundles_post_ra>
